<compile_context>
chip_gen: v7x
topology: tpu7x:2x2x1
jax: 0.10.0
libtpu: 0.0.40
codegen_flags: <defaults>
</compile_context>

<pallas_src>
import functools
import math

import jax
import jax.numpy as jnp
from jax.experimental import pallas as pl
from jax.experimental.pallas import tpu as pltpu

_LANE = 128


def _layer_scale_kernel(x_ref, gamma_ref, out_ref):
    # x_ref:     (tm, tn) tile of the (packed) flattened input
    # gamma_ref: (1, tn)  broadcast row of the (packed) gamma
    # out_ref:   (tm, tn) output tile
    out_ref[...] = x_ref[...] * gamma_ref[...]


@functools.partial(
    jax.jit,
    static_argnames=("target_tile_bytes", "min_pallas_bytes", "force_pallas"),
)
def layer_scale(
    x: jax.Array,
    gamma: jax.Array,
    *,
    target_tile_bytes: int = 2 * 1024 * 1024,
    min_pallas_bytes: int = 1 * 1024 * 1024,
    force_pallas: bool = False,
) -> jax.Array:
    """Computes x * gamma with gamma broadcast over the last axis of x."""
    orig_shape = x.shape
    dim = orig_shape[-1]
    assert gamma.shape == (dim,), f"gamma must have shape ({dim},), got {gamma.shape}"

    # NOTE: gamma is cast to x.dtype (matches PyTorch's result dtype for f32;
    # for bf16 inputs this rounds gamma before the multiply).
    gamma = gamma.astype(x.dtype)
    itemsize = jnp.dtype(x.dtype).itemsize

    # Fast path: for tiny inputs the pallas_call launch/DMA overhead dominates;
    # let XLA fuse the multiply.
    if (not force_pallas) and (x.size * itemsize < min_pallas_bytes):
        return x * gamma

    # Flatten all leading axes into a row axis M; D stays as the lane axis.
    x2d = x.reshape(-1, dim)
    m = x2d.shape[0]

    # ---- Lane-dense packing: (M, D) -> (M // k, k * D) with k*D % 128 == 0.
    k = _LANE // math.gcd(dim, _LANE)
    if k > 1 and m % k != 0:
        k = 1  # ragged remainder: fall back to unpacked layout
    m_packed = m // k
    d_packed = dim * k
    x2d = x2d.reshape(m_packed, d_packed)
    gamma_row = (jnp.tile(gamma, k) if k > 1 else gamma).reshape(1, d_packed)

    # ---- Tile sizing (bytes-based, dtype-aware sublane alignment).
    sub = max(8, 32 // itemsize)  # 8 for f32, 16 for bf16, 32 for int8/fp8

    if d_packed % _LANE == 0:
        max_tn = max(_LANE, (target_tile_bytes // (sub * itemsize)) // _LANE * _LANE)
        tn = min(d_packed, max_tn)
    else:
        tn = d_packed  # full-extent last dim is always a legal block

    rows_for_target = target_tile_bytes // (tn * itemsize)
    tm = min(m_packed, max(sub, (rows_for_target // sub) * sub))
    # (if tm == m_packed it is a full-extent block, which is legal even when
    #  m_packed is not a multiple of `sub`)

    grid = (pl.cdiv(m_packed, tm), pl.cdiv(d_packed, tn))

    out = pl.pallas_call(
        _layer_scale_kernel,
        out_shape=jax.ShapeDtypeStruct((m_packed, d_packed), x.dtype),
        grid_spec=pltpu.PrefetchScalarGridSpec(
            num_scalar_prefetch=0,
            grid=grid,
            in_specs=[
                pl.BlockSpec((tm, tn), lambda i, j: (i, j)),
                pl.BlockSpec((1, tn), lambda i, j: (0, j)),
            ],
            out_specs=pl.BlockSpec((tm, tn), lambda i, j: (i, j)),
        ),
        compiler_params=pltpu.CompilerParams(
            dimension_semantics=("parallel", "parallel"),
        ),
    )(x2d, gamma_row)

    return out.reshape(orig_shape)


if __name__ == "__main__":
    # Module config: LayerScale(dim=32, init_values=1e-5)
    dim = 32
    init_values = 1e-5

    # Deterministic parameter init, matching `init_values * torch.ones(dim)`.
    gamma = init_values * jnp.ones((dim,), dtype=jnp.float32)

    key = jax.random.PRNGKey(0)
    k0, k1 = jax.random.split(key)

    # Test 1: small transformer-token shape (batch=2, seq=8, hidden=32);
    # force the Pallas path (it would otherwise take the fused fast path).
    x_small = jax.random.normal(k0, (2, 8, dim), dtype=jnp.float32)
    y_small = jax.block_until_ready(layer_scale(x_small, gamma, force_pallas=True))
    assert y_small.shape == x_small.shape and y_small.dtype == x_small.dtype
    assert jnp.allclose(y_small, x_small * gamma, atol=1e-6, rtol=1e-6)

    # Also check the small-input fast path (no kernel launch).
    y_fast = jax.block_until_ready(layer_scale(x_small, gamma))
    assert jnp.allclose(y_fast, x_small * gamma, atol=1e-6, rtol=1e-6)

    # Test 2: larger shape exercising lane packing (32 -> 128) and a
    # multi-step row grid (small tile budget chosen to force >1 grid step).
    x_big = jax.random.normal(k1, (4, 1024, dim), dtype=jnp.float32)
    y_big = jax.block_until_ready(
        layer_scale(x_big, gamma, target_tile_bytes=64 * 1024, force_pallas=True)
    )
    assert y_big.shape == x_big.shape and y_big.dtype == x_big.dtype
    assert jnp.allclose(y_big, x_big * gamma, atol=1e-6, rtol=1e-6)

    print("KERNEL_OK")
</pallas_src>

<mosaic_0001>
module attributes {stable_mosaic.version = 11 : i64} {
  func.func @_layer_scale_kernel(%arg0: i32, %arg1: i32, %arg2: memref<4x128xf32, #tpu.memory_space<vmem>>, %arg3: memref<1x128xf32, #tpu.memory_space<vmem>>, %arg4: memref<4x128xf32, #tpu.memory_space<vmem>>) attributes {dimension_semantics = [#tpu.dimension_semantics<parallel>, #tpu.dimension_semantics<parallel>], iteration_bounds = array<i64: 1, 1>, scalar_prefetch = 0 : i64, scratch_operands = 0 : i64, tpu.core_type = #tpu.core_type<tc>, window_params = [{transform_indices = @transform_0, window_bounds = array<i64: 4, 128>}, {transform_indices = @transform_1, window_bounds = array<i64: 1, 128>}, {transform_indices = @transform_2, window_bounds = array<i64: 4, 128>}]} {
    %c0 = arith.constant 0 : index
    %c0_0 = arith.constant 0 : index
    %0 = vector.load %arg2[%c0, %c0_0] : memref<4x128xf32, #tpu.memory_space<vmem>>, vector<4x128xf32>
    %c0_1 = arith.constant 0 : index
    %c0_2 = arith.constant 0 : index
    %1 = vector.load %arg3[%c0_1, %c0_2] : memref<1x128xf32, #tpu.memory_space<vmem>>, vector<1x128xf32>
    %2 = vector.broadcast %1 : vector<1x128xf32> to vector<4x128xf32>
    %3 = arith.mulf %0, %2 : vector<4x128xf32>
    %c0_3 = arith.constant 0 : index
    %c0_4 = arith.constant 0 : index
    %4 = vector.load %arg4[%c0_3, %c0_4] : memref<4x128xf32, #tpu.memory_space<vmem>>, vector<4x128xf32>
    tpu.vector_store %arg4[%c0_3, %c0_4], %3 {strides = array<i32>} : memref<4x128xf32, #tpu.memory_space<vmem>>, vector<4x128xf32>,
    return
  }
  func.func @transform_0(%arg0: i32, %arg1: i32) -> (i32, i32) {
    %c0_i32 = arith.constant 0 : i32
    return %arg0, %arg1 : i32, i32
  }
  func.func @transform_1(%arg0: i32, %arg1: i32) -> (i32, i32) {
    %c0_i32 = arith.constant 0 : i32
    %c0_i32_0 = arith.constant 0 : i32
    return %c0_i32, %arg1 : i32, i32
  }
  func.func @transform_2(%arg0: i32, %arg1: i32) -> (i32, i32) {
    %c0_i32 = arith.constant 0 : i32
    return %arg0, %arg1 : i32, i32
  }
}

</mosaic_0001>

<bundles_post_ra>
// kernel: tile.8
= control target key start
LH: loop header
LB: loop body
LE: loop exit
PB: predicated region body
PF: predicated region fallthrough
CT: control target
= control target key end

     0   :  { %s22_s0 = inlined_call_operand.vmem [shape: f32[32], index: 0, kind: input, shape index: {}]   ;;  %s23_s1 = inlined_call_operand.vmem [shape: f32[4,32], index: 1, kind: output, shape index: {}]  }
   0x1   :  { %v4_v0 = vld [vmem:[%s22_s0] ss:$0 sm:$0xff] }
   0x2   :  { %5 = vst [vmem:[%s23_s1] sm:$0xf] %v4_v0 }

// kernel: tile.9
= control target key start
LH: loop header
LB: loop body
LE: loop exit
PB: predicated region body
PF: predicated region fallthrough
CT: control target
= control target key end

     0   :  { %vm7_vm0 = vcmask 261120   ;;  %s37_s8 = smov 32   ;;  %s38_s9 = smov 64   ;;  %vm13_vm1 = vcmask 1048320   ;;  %vm19_vm2 = vcmask 785920   ;;  %vm25_vm3 = vcmask 523520   ;;  %s55_s0 = inlined_call_operand.vmem [shape: f32[4,32], index: 0, kind: input, shape index: {}]   ;;  %s56_s1 = inlined_call_operand.vmem [shape: f32[1,128], index: 1, kind: output, shape index: {}]  }
   0x1   :  { %v4_v0 = vld [vmem:[%s55_s0] sm:$0xf]  ;;  %s36_s0 = smov 96  }
   0x2   :  { %5 = vst [vmem:[#allocation1] sm:$0xf] %v4_v0 }
   0x9   :  { %v10_v1 = vld [vmem:[#allocation1 + $0x3] sm:$0x1]   ;;  %v22_v2 = vld [vmem:[#allocation1 + $0x1] sm:$0x1]   ;;  %v6_v3 = vld [vmem:[#allocation1] sm:$0x1]  }
   0xa   :  { %11 = vrot.lane.b32.xlu0 %v10_v1, %s36_s0  ;;  %23 = vrot.lane.b32.xlu1 %v22_v2, %s37_s8  ;;  %v16_v4 = vld [vmem:[#allocation1 + $0x2] sm:$0x1]   ;;  %8 = vst.msk [vmem:[#allocation0] sm:$0x1] %vm7_vm0, %v6_v3  }
   0xe   :  { %17 = vrot.lane.b32.xlu0 %v16_v4, %s38_s9 }
  0x7c   :  { %v12_v5 = vpop.permute.xlu0 %11   ;;  %v24_v6 = vpop.permute.xlu1 %23  }
  0x7d   :  { %14 = vst.msk [vmem:[#allocation0] sm:$0x1] %vm13_vm1, %v12_v5  }
  0x80   :  { %v18_v7 = vpop.permute.xlu0 %17  }
  0x81   :  { %20 = vst.msk [vmem:[#allocation0] sm:$0x1] %vm19_vm2, %v18_v7  }
  0x82   :  { %26 = vst.msk [vmem:[#allocation0] sm:$0x1] %vm25_vm3, %v24_v6  }
  0x89   :  { %v30_v8 = vld [vmem:[#allocation0] sm:$0x1] }
  0x8a   :  { %32 = vst [vmem:[%s56_s1] sm:$0x1] %v30_v8 }

// kernel: layer_scale.1
= control target key start
LH: loop header
LB: loop body
LE: loop exit
PB: predicated region body
PF: predicated region fallthrough
CT: control target
= control target key end

     0   :  { %s50_s0 = inlined_call_operand.vmem [shape: f32[4,128], index: 0, kind: input, shape index: {}]   ;;  %s51_s1 = inlined_call_operand.vmem [shape: f32[1,128], index: 1, kind: input, shape index: {}]   ;;  %s52_s2 = inlined_call_operand.vmem [shape: f32[4,128], index: 2, kind: output, shape index: {}]  }
   0x1   :  { %v11_v0 = vld [vmem:[%s50_s0] sm:$0xf] }
   0x2   :  { %v25_v1 = vld [vmem:[%s51_s1] ss:$0 sm:$0xff] }
   0x3   :  { %v19_v2 = vmul.f32 %v25_v1, %v11_v0 }
   0x5   :  { %20 = vst [vmem:[%s52_s2] sm:$0xf] %v19_v2 }

</bundles_post_ra>
